<compile_context>
chip_gen: v7x
topology: tpu7x:2x2x1
jax: 0.10.0
libtpu: 0.0.40
codegen_flags: <defaults>
</compile_context>

<pallas_src>
import functools

import jax
import jax.numpy as jnp
from jax.experimental import pallas as pl
from jax.experimental.pallas import tpu as pltpu

_F = 14          # feature count of the module
_F_PAD = 16      # sublane-padded feature count (multiple of 8)
_LANE = 128
_EPS = 1e-5


def _disc_kernel(params_ref, x_ref, o_ref,
                 sum_ref, ssq_ref, weff_ref, beff_ref, *, inv_n):
    p = pl.program_id(0)   # 0 = stats pass, 1 = apply pass
    t = pl.program_id(1)   # batch tile index

    @pl.when((p == 0) & (t == 0))
    def _init():
        sum_ref[...] = jnp.zeros_like(sum_ref)
        ssq_ref[...] = jnp.zeros_like(ssq_ref)

    @pl.when(p == 0)
    def _accumulate():
        x = x_ref[...]                                          # (F_pad, tile_b)
        sum_ref[...] += jnp.sum(x, axis=1, keepdims=True)       # lane reduce
        ssq_ref[...] += jnp.sum(x * x, axis=1, keepdims=True)

    @pl.when((p == 1) & (t == 0))
    def _fold_bn_into_linear():
        gamma = params_ref[:, 0:1]
        beta = params_ref[:, 1:2]
        w = params_ref[:, 2:3]
        bias_col = params_ref[:, 3:4]                           # [b, 0, ..., 0]^T
        mean = sum_ref[...] * inv_n                             # (F_pad, 1)
        var = ssq_ref[...] * inv_n - mean * mean                # biased (train-mode) var
        inv_std = jax.lax.rsqrt(var + _EPS)
        scale = gamma * inv_std
        weff_ref[...] = w * scale                               # (F_pad, 1)
        beff_ref[...] = jnp.sum(w * (beta - mean * scale) + bias_col,
                                axis=0, keepdims=True)          # (1, 1)

    @pl.when(p == 1)
    def _apply():
        x = x_ref[...]                                          # (F_pad, tile_b)
        # 14-term multiply-accumulate per column + sublane reduce;
        # deliberately NOT an MXU matmul (K=14, N=1 is a degenerate shape).
        z = jnp.sum(x * weff_ref[...], axis=0, keepdims=True) + beff_ref[...]
        o_ref[...] = jax.nn.sigmoid(z).astype(o_ref.dtype)      # lane-dense (1, tile_b)


def discriminator_r_adult(x, gamma, beta, w, b):
    """BatchNorm1d(14) -> Linear(14, 1) -> Sigmoid with train-mode batch stats.

    x: (B, 14) f32; gamma/beta: (14,); w: (14,) (= Linear weight[0]); b: scalar.
    Returns (B, 1) f32.
    """
    B, F = x.shape
    assert F == _F

    # Lane-aligned batch padding & tiling (tiles capped at 1024 columns so the
    # kernel pipelines within scoped VMEM on all of v5e/v6e/v7x).
    b_pad = max(_LANE, -(-B // _LANE) * _LANE)
    tile_b = min(b_pad, 1024)
    b_pad = -(-b_pad // tile_b) * tile_b
    num_tiles = b_pad // tile_b

    # (F, B) layout, zero-padded: padded columns contribute nothing to the
    # sums and we divide by the true B inside the kernel; padded feature rows
    # carry zero weight so they never reach the output.
    xt = jnp.pad(x.astype(jnp.float32).T, ((0, _F_PAD - F), (0, b_pad - B)))

    # One packed parameter block: [gamma | beta | w | bias-one-hot].
    params = jnp.zeros((_F_PAD, 4), jnp.float32)
    params = params.at[:F, 0].set(gamma.astype(jnp.float32))
    params = params.at[:F, 1].set(beta.astype(jnp.float32))
    params = params.at[:F, 2].set(w.astype(jnp.float32))
    params = params.at[0, 3].set(jnp.asarray(b, jnp.float32))

    kernel = functools.partial(_disc_kernel, inv_n=1.0 / B)

    # NOTE: for very large B the apply pass could be split into a second
    # pallas_call with "parallel" semantics to let v7x's two TensorCores share
    # the mem-bound work; a single 2-pass grid keeps call overhead minimal here.
    out = pl.pallas_call(
        kernel,
        out_shape=jax.ShapeDtypeStruct((1, b_pad), jnp.float32),
        grid_spec=pltpu.PrefetchScalarGridSpec(
            num_scalar_prefetch=0,
            grid=(2, num_tiles),                                   # (pass, batch tile)
            in_specs=[
                pl.BlockSpec((_F_PAD, 4), lambda p, t: (0, 0)),       # params (resident)
                pl.BlockSpec((_F_PAD, tile_b), lambda p, t: (0, t)),  # x tile
            ],
            # pass 0 parks on block 0 (never written back); pass 1 writes each
            # block exactly once -> lane-dense, unmasked stores.
            out_specs=pl.BlockSpec((1, tile_b), lambda p, t: (0, t * p)),
            scratch_shapes=[
                pltpu.VMEM((_F_PAD, 1), jnp.float32),   # running sum
                pltpu.VMEM((_F_PAD, 1), jnp.float32),   # running sum of squares
                pltpu.VMEM((_F_PAD, 1), jnp.float32),   # folded weights w_eff
                pltpu.VMEM((1, 1), jnp.float32),        # folded bias b_eff
            ],
        ),
        compiler_params=pltpu.CompilerParams(
            dimension_semantics=("arbitrary", "arbitrary")),
        cost_estimate=pl.CostEstimate(
            flops=10 * b_pad * _F_PAD,
            transcendentals=b_pad + _F_PAD,
            bytes_accessed=2 * 4 * b_pad * _F_PAD + 4 * b_pad + 4 * _F_PAD * 4),
    )(params, xt)

    return out[0, :B].reshape(B, 1)


def _reference(x, gamma, beta, w, b):
    mean = jnp.mean(x, axis=0, keepdims=True)
    var = jnp.mean((x - mean) ** 2, axis=0, keepdims=True)
    xn = (x - mean) / jnp.sqrt(var + _EPS) * gamma + beta
    return jax.nn.sigmoid(xn @ w.reshape(-1, 1) + b)


if __name__ == "__main__":
    key = jax.random.PRNGKey(0)
    kx, kg, kbt, kw, kb = jax.random.split(key, 5)

    B, F = 8, 14
    x = jax.random.normal(kx, (B, F), dtype=jnp.float32)

    # BatchNorm1d default init is weight=1, bias=0; perturb slightly so the
    # folded-BN path is exercised with non-trivial affine parameters.
    gamma = 1.0 + 0.1 * jax.random.normal(kg, (F,), dtype=jnp.float32)
    beta = 0.1 * jax.random.normal(kbt, (F,), dtype=jnp.float32)

    # Linear(14, 1): deterministic synthetic init (uniform in +-1/sqrt(14)).
    bound = 1.0 / float(F) ** 0.5
    w = jax.random.uniform(kw, (F,), minval=-bound, maxval=bound, dtype=jnp.float32)
    b = jax.random.uniform(kb, (), minval=-bound, maxval=bound, dtype=jnp.float32)

    out = discriminator_r_adult(x, gamma, beta, w, b)
    out = jax.block_until_ready(out)

    ref = _reference(x, gamma, beta, w, b)
    assert out.shape == (B, 1), out.shape
    assert jnp.allclose(out, ref, atol=1e-5, rtol=1e-5), (out, ref)

    print("KERNEL_OK")
</pallas_src>

<mosaic_0001>
module attributes {stable_mosaic.version = 11 : i64} {
  func.func @_disc_kernel(%arg0: i32, %arg1: i32, %arg2: memref<16x4xf32, #tpu.memory_space<vmem>>, %arg3: memref<16x128xf32, #tpu.memory_space<vmem>>, %arg4: memref<1x128xf32, #tpu.memory_space<vmem>>, %arg5: memref<16x1xf32, #tpu.memory_space<vmem>>, %arg6: memref<16x1xf32, #tpu.memory_space<vmem>>, %arg7: memref<16x1xf32, #tpu.memory_space<vmem>>, %arg8: memref<1x1xf32, #tpu.memory_space<vmem>>) attributes {dimension_semantics = [#tpu.dimension_semantics<arbitrary>, #tpu.dimension_semantics<arbitrary>], iteration_bounds = array<i64: 2, 1>, scalar_prefetch = 0 : i64, scratch_operands = 4 : i64, tpu.core_type = #tpu.core_type<tc>, window_params = [{pipeline_mode = #tpu.pipeline_mode<synchronous>, transform_indices = @transform_0, window_bounds = array<i64: 16, 4>}, {transform_indices = @transform_1, window_bounds = array<i64: 16, 128>}, {transform_indices = @transform_2, window_bounds = array<i64: 1, 128>}]} {
    %c0_i32 = arith.constant 0 : i32
    %0 = arith.cmpi eq, %arg0, %c0_i32 : i32
    %c0_i32_0 = arith.constant 0 : i32
    %1 = arith.cmpi eq, %arg1, %c0_i32_0 : i32
    %2 = arith.andi %0, %1 : i1
    %3 = arith.extui %2 : i1 to i32
    %c0_i32_1 = arith.constant 0 : i32
    %4 = arith.cmpi ne, %3, %c0_i32_1 : i32
    scf.if %4 {
      %cst = arith.constant 0.000000e+00 : f32
      %16 = vector.broadcast %cst : f32 to vector<16x1xf32>
      %c0 = arith.constant 0 : index
      %c0_8 = arith.constant 0 : index
      %17 = vector.load %arg5[%c0, %c0_8] : memref<16x1xf32, #tpu.memory_space<vmem>>, vector<16x1xf32>
      tpu.vector_store %arg5[%c0, %c0_8], %16 {strides = array<i32>} : memref<16x1xf32, #tpu.memory_space<vmem>>, vector<16x1xf32>,
      %cst_9 = arith.constant 0.000000e+00 : f32
      %18 = vector.broadcast %cst_9 : f32 to vector<16x1xf32>
      %c0_10 = arith.constant 0 : index
      %c0_11 = arith.constant 0 : index
      %19 = vector.load %arg6[%c0_10, %c0_11] : memref<16x1xf32, #tpu.memory_space<vmem>>, vector<16x1xf32>
      tpu.vector_store %arg6[%c0_10, %c0_11], %18 {strides = array<i32>} : memref<16x1xf32, #tpu.memory_space<vmem>>, vector<16x1xf32>,
    } else {
    }
    %c0_i32_2 = arith.constant 0 : i32
    %5 = arith.cmpi eq, %arg0, %c0_i32_2 : i32
    %6 = arith.extui %5 : i1 to i32
    %c0_i32_3 = arith.constant 0 : i32
    %7 = arith.cmpi ne, %6, %c0_i32_3 : i32
    scf.if %7 {
      %c0 = arith.constant 0 : index
      %c0_8 = arith.constant 0 : index
      %16 = vector.load %arg3[%c0, %c0_8] : memref<16x128xf32, #tpu.memory_space<vmem>>, vector<16x128xf32>
      %c0_9 = arith.constant 0 : index
      %c0_10 = arith.constant 0 : index
      %17 = vector.load %arg5[%c0_9, %c0_10] : memref<16x1xf32, #tpu.memory_space<vmem>>, vector<16x1xf32>
      %cst = arith.constant dense<0.000000e+00> : vector<16xf32>
      %18 = vector.multi_reduction <add>, %16, %cst [1] : vector<16x128xf32> to vector<16xf32>
      %19 = vector.shape_cast %18 : vector<16xf32> to vector<16x1xf32>
      %20 = arith.addf %17, %19 : vector<16x1xf32>
      %c0_11 = arith.constant 0 : index
      %c0_12 = arith.constant 0 : index
      %21 = vector.load %arg5[%c0_11, %c0_12] : memref<16x1xf32, #tpu.memory_space<vmem>>, vector<16x1xf32>
      tpu.vector_store %arg5[%c0_11, %c0_12], %20 {strides = array<i32>} : memref<16x1xf32, #tpu.memory_space<vmem>>, vector<16x1xf32>,
      %c0_13 = arith.constant 0 : index
      %c0_14 = arith.constant 0 : index
      %22 = vector.load %arg6[%c0_13, %c0_14] : memref<16x1xf32, #tpu.memory_space<vmem>>, vector<16x1xf32>
      %23 = arith.mulf %16, %16 : vector<16x128xf32>
      %cst_15 = arith.constant dense<0.000000e+00> : vector<16xf32>
      %24 = vector.multi_reduction <add>, %23, %cst_15 [1] : vector<16x128xf32> to vector<16xf32>
      %25 = vector.shape_cast %24 : vector<16xf32> to vector<16x1xf32>
      %26 = arith.addf %22, %25 : vector<16x1xf32>
      %c0_16 = arith.constant 0 : index
      %c0_17 = arith.constant 0 : index
      %27 = vector.load %arg6[%c0_16, %c0_17] : memref<16x1xf32, #tpu.memory_space<vmem>>, vector<16x1xf32>
      tpu.vector_store %arg6[%c0_16, %c0_17], %26 {strides = array<i32>} : memref<16x1xf32, #tpu.memory_space<vmem>>, vector<16x1xf32>,
    } else {
    }
    %c1_i32 = arith.constant 1 : i32
    %8 = arith.cmpi eq, %arg0, %c1_i32 : i32
    %c0_i32_4 = arith.constant 0 : i32
    %9 = arith.cmpi eq, %arg1, %c0_i32_4 : i32
    %10 = arith.andi %8, %9 : i1
    %11 = arith.extui %10 : i1 to i32
    %c0_i32_5 = arith.constant 0 : i32
    %12 = arith.cmpi ne, %11, %c0_i32_5 : i32
    scf.if %12 {
      %c0 = arith.constant 0 : index
      %c0_8 = arith.constant 0 : index
      %16 = vector.load %arg2[%c0, %c0_8] : memref<16x4xf32, #tpu.memory_space<vmem>>, vector<16x1xf32>
      %c0_9 = arith.constant 0 : index
      %c1 = arith.constant 1 : index
      %17 = vector.load %arg2[%c0_9, %c1] : memref<16x4xf32, #tpu.memory_space<vmem>>, vector<16x1xf32>
      %c0_10 = arith.constant 0 : index
      %c2 = arith.constant 2 : index
      %18 = vector.load %arg2[%c0_10, %c2] : memref<16x4xf32, #tpu.memory_space<vmem>>, vector<16x1xf32>
      %c0_11 = arith.constant 0 : index
      %c3 = arith.constant 3 : index
      %19 = vector.load %arg2[%c0_11, %c3] : memref<16x4xf32, #tpu.memory_space<vmem>>, vector<16x1xf32>
      %c0_12 = arith.constant 0 : index
      %c0_13 = arith.constant 0 : index
      %20 = vector.load %arg5[%c0_12, %c0_13] : memref<16x1xf32, #tpu.memory_space<vmem>>, vector<16x1xf32>
      %cst = arith.constant 1.250000e-01 : f32
      %21 = vector.broadcast %cst : f32 to vector<16x1xf32>
      %22 = arith.mulf %20, %21 : vector<16x1xf32>
      %c0_14 = arith.constant 0 : index
      %c0_15 = arith.constant 0 : index
      %23 = vector.load %arg6[%c0_14, %c0_15] : memref<16x1xf32, #tpu.memory_space<vmem>>, vector<16x1xf32>
      %cst_16 = arith.constant 1.250000e-01 : f32
      %24 = vector.broadcast %cst_16 : f32 to vector<16x1xf32>
      %25 = arith.mulf %23, %24 : vector<16x1xf32>
      %26 = arith.mulf %22, %22 : vector<16x1xf32>
      %27 = arith.subf %25, %26 : vector<16x1xf32>
      %cst_17 = arith.constant 9.99999974E-6 : f32
      %28 = vector.broadcast %cst_17 : f32 to vector<16x1xf32>
      %29 = arith.addf %27, %28 : vector<16x1xf32>
      %30 = math.rsqrt %29 : vector<16x1xf32>
      %31 = arith.mulf %16, %30 : vector<16x1xf32>
      %32 = arith.mulf %18, %31 : vector<16x1xf32>
      %c0_18 = arith.constant 0 : index
      %c0_19 = arith.constant 0 : index
      %33 = vector.load %arg7[%c0_18, %c0_19] : memref<16x1xf32, #tpu.memory_space<vmem>>, vector<16x1xf32>
      tpu.vector_store %arg7[%c0_18, %c0_19], %32 {strides = array<i32>} : memref<16x1xf32, #tpu.memory_space<vmem>>, vector<16x1xf32>,
      %34 = arith.mulf %22, %31 : vector<16x1xf32>
      %35 = arith.subf %17, %34 : vector<16x1xf32>
      %36 = arith.mulf %18, %35 : vector<16x1xf32>
      %37 = arith.addf %36, %19 : vector<16x1xf32>
      %cst_20 = arith.constant dense<0.000000e+00> : vector<1xf32>
      %38 = vector.multi_reduction <add>, %37, %cst_20 [0] : vector<16x1xf32> to vector<1xf32>
      %39 = vector.shape_cast %38 : vector<1xf32> to vector<1x1xf32>
      %c0_21 = arith.constant 0 : index
      %c0_22 = arith.constant 0 : index
      %40 = vector.load %arg8[%c0_21, %c0_22] : memref<1x1xf32, #tpu.memory_space<vmem>>, vector<1x1xf32>
      tpu.vector_store %arg8[%c0_21, %c0_22], %39 {strides = array<i32>} : memref<1x1xf32, #tpu.memory_space<vmem>>, vector<1x1xf32>,
    } else {
    }
    %c1_i32_6 = arith.constant 1 : i32
    %13 = arith.cmpi eq, %arg0, %c1_i32_6 : i32
    %14 = arith.extui %13 : i1 to i32
    %c0_i32_7 = arith.constant 0 : i32
    %15 = arith.cmpi ne, %14, %c0_i32_7 : i32
    scf.if %15 {
      %c0 = arith.constant 0 : index
      %c0_8 = arith.constant 0 : index
      %16 = vector.load %arg3[%c0, %c0_8] : memref<16x128xf32, #tpu.memory_space<vmem>>, vector<16x128xf32>
      %c0_9 = arith.constant 0 : index
      %c0_10 = arith.constant 0 : index
      %17 = vector.load %arg7[%c0_9, %c0_10] : memref<16x1xf32, #tpu.memory_space<vmem>>, vector<16x1xf32>
      %18 = vector.broadcast %17 : vector<16x1xf32> to vector<16x128xf32>
      %19 = arith.mulf %16, %18 : vector<16x128xf32>
      %cst = arith.constant dense<0.000000e+00> : vector<128xf32>
      %20 = vector.multi_reduction <add>, %19, %cst [0] : vector<16x128xf32> to vector<128xf32>
      %21 = vector.shape_cast %20 : vector<128xf32> to vector<1x128xf32>
      %c0_11 = arith.constant 0 : index
      %c0_12 = arith.constant 0 : index
      %22 = vector.load %arg8[%c0_11, %c0_12] : memref<1x1xf32, #tpu.memory_space<vmem>>, vector<1x1xf32>
      %23 = vector.broadcast %22 : vector<1x1xf32> to vector<1x128xf32>
      %24 = arith.addf %21, %23 : vector<1x128xf32>
      %25 = arith.negf %24 : vector<1x128xf32>
      %26 = math.exp %25 : vector<1x128xf32>
      %cst_13 = arith.constant 1.000000e+00 : f32
      %27 = vector.broadcast %cst_13 : f32 to vector<1x128xf32>
      %28 = arith.addf %27, %26 : vector<1x128xf32>
      %29 = arith.divf %27, %28 : vector<1x128xf32>
      %c0_14 = arith.constant 0 : index
      %c0_15 = arith.constant 0 : index
      %30 = vector.load %arg4[%c0_14, %c0_15] : memref<1x128xf32, #tpu.memory_space<vmem>>, vector<1x128xf32>
      tpu.vector_store %arg4[%c0_14, %c0_15], %29 {strides = array<i32>} : memref<1x128xf32, #tpu.memory_space<vmem>>, vector<1x128xf32>,
    } else {
    }
    return
  }
  func.func @transform_0(%arg0: i32, %arg1: i32) -> (i32, i32) {
    %c0_i32 = arith.constant 0 : i32
    %c0_i32_0 = arith.constant 0 : i32
    %c0_i32_1 = arith.constant 0 : i32
    return %c0_i32, %c0_i32_0 : i32, i32
  }
  func.func @transform_1(%arg0: i32, %arg1: i32) -> (i32, i32) {
    %c0_i32 = arith.constant 0 : i32
    %c0_i32_0 = arith.constant 0 : i32
    return %c0_i32, %arg1 : i32, i32
  }
  func.func @transform_2(%arg0: i32, %arg1: i32) -> (i32, i32) {
    %0 = arith.muli %arg1, %arg0 : i32
    %c0_i32 = arith.constant 0 : i32
    %c0_i32_0 = arith.constant 0 : i32
    return %c0_i32, %0 : i32, i32
  }
}

</mosaic_0001>

<bundles_post_ra>
// kernel: tpu_custom_call.1
= control target key start
LH: loop header
LB: loop body
LE: loop exit
PB: predicated region body
PF: predicated region fallthrough
CT: control target
= control target key end

     0   :  { %7 = vsyncpa [#allocation7], 0  ;;  %s636_s0 = inlined_call_operand.vmem [shape: f32[16,4], index: 0, kind: input, shape index: {}]   ;;  %s637_s1 = inlined_call_operand.vmem [shape: f32[16,128], index: 1, kind: input, shape index: {}]   ;;  %s638_s2 = inlined_call_operand.hbm [shape: f32[1,128], index: 2, kind: output, shape index: {}]  }
   0x1   :  { %9 = vsyncpa [#allocation7 + $0x1], 0  ;;  %s554_s9 = smov 0   ;;  %s556_s10 = smov 0  }
   0x2   :  { %s558_s11 = smov 0  }
   0x3 LB: > { %s410_s12 = sadd.s32 4294967295, %s530_s11   ;;  %s411_s13 = sadd.s32 4294967294, %s530_s11   ;;  %s530_s11 = sphi %s558_s11, %s15_s11   ;;  %s526_s10 = sphi %s556_s10, %s641_s10   ;;  %s522_s9 = sphi %s554_s9, %s640_s9  }
   0x4   : > { %s27_s14 = sadd.s32 1, %s526_s10  ;;  %p414_p0 = scmp.ge.s32.totalorder %s530_s11, 1 }
   0x5   : > { %p29_p1 = scmp.ge.s32.totalorder %s27_s14, 2  ;;  %p128_p2 = scmp.lt.s32.totalorder %s530_s11, 3 }
   0x7   : > { %s643_s14 = smov (%p29_p1, %s27_s14), 0  ;;  %p129_p3 = pnand %p414_p0, %p128_p2 }
   0x8   : > { %p153_p4 = scmp.eq.s32.totalorder (!%p129_p3), %s522_s9, 0 }
   0x9   : > { %132 = sbr.rel (%p129_p3) target bundleno = 777 (0x309), region = 28 }
  0x10   : > { %158 = sbr.rel (!%p153_p4) target bundleno = 23 (0x17), region = 32  ;;  %vm159_vm0 = vcmask (%p153_p4), 7168   ;;  %v532_v0 = vmov (%p153_p4), 0.0  }
  0x11   : > { %160 = vst.msk [vmem:[#allocation2] sm:$0xff] (%p153_p4), %vm159_vm0, %v532_v0  ;;  %161 = vst.msk [vmem:[#allocation2 + $0x8] sm:$0xff] (%p153_p4), %vm159_vm0, %v532_v0 }
  0x12   : > { %162 = vst.msk [vmem:[#allocation3] sm:$0xff] (%p153_p4), %vm159_vm0, %v532_v0  ;;  %163 = vst.msk [vmem:[#allocation3 + $0x8] sm:$0xff] (%p153_p4), %vm159_vm0, %v532_v0 }
  0x17 PF: > { %p416_p5 = scmp.ne.s32.totalorder %s522_s9, 0 }
  0x18   : > { %v167_v1 = vld [vmem:[%s637_s1] sm:$0xff] (!%p416_p5)  ;;  %v168_v2 = vld [vmem:[%s637_s1 + $0x8] sm:$0xff] (!%p416_p5)  ;;  %v169_v5 = vld [vmem:[#allocation2] sm:$0xff] (!%p416_p5)  ;;  %vm177_vm1 = vcmask (!%p416_p5), 7168  }
  0x19   : > { %166 = sbr.rel (%p416_p5) target bundleno = 176 (0xb0), region = 36  ;;  %171 = vadd.xlane.f32.xlu0 (!%p416_p5), %v167_v1  ;;  %v182_v3 = vmul.f32 (!%p416_p5), %v167_v1, %v167_v1  ;;  %v183_v4 = vmul.f32 (!%p416_p5), %v168_v2, %v168_v2  ;;  %v180_v7 = vld [vmem:[#allocation3] sm:$0xff] (!%p416_p5)  ;;  %v170_v10 = vld [vmem:[#allocation2 + $0x8] sm:$0xff] (!%p416_p5)  ;;  %v181_v13 = vld [vmem:[#allocation3 + $0x8] sm:$0xff] (!%p416_p5) }
  0x1b   : > { %184 = vadd.xlane.f32.xlu1 (!%p416_p5), %v182_v3 }
  0x1d   : > { %173 = vadd.xlane.f32.xlu0 (!%p416_p5), %v168_v2 }
  0x1f   : > { %186 = vadd.xlane.f32.xlu1 (!%p416_p5), %v183_v4 }
  0xa6   : > { %v172_v6 = vpop.xlane.xlu0 %171 }
  0xa7   : > { %v175_v8 = vadd.f32 %v172_v6, %v169_v5 }
  0xa8   : > { %v185_v9 = vpop.xlane.xlu1 %184 }
  0xa9   : > { %178 = vst.msk [vmem:[#allocation2] sm:$0xff] %vm177_vm1, %v175_v8  ;;  %v188_v11 = vadd.f32 %v185_v9, %v180_v7 }
  0xaa   : > { %v174_v12 = vpop.xlane.xlu0 %173 }
  0xab   : > { %190 = vst.msk [vmem:[#allocation3] sm:$0xff] %vm177_vm1, %v188_v11  ;;  %v176_v14 = vadd.f32 %v174_v12, %v170_v10 }
  0xac   : > { %v187_v15 = vpop.xlane.xlu1 %186 }
  0xad   : > { %179 = vst.msk [vmem:[#allocation2 + $0x8] sm:$0xff] %vm177_vm1, %v176_v14  ;;  %v189_v16 = vadd.f32 %v187_v15, %v181_v13 }
  0xaf   : > { %191 = vst.msk [vmem:[#allocation3 + $0x8] sm:$0xff] %vm177_vm1, %v189_v16 }
  0xb0 PF: > { %p192_p6 = scmp.eq.s32.totalorder %s522_s9, 1 }
  0xb1   : > { %v199_v17 = vld [vmem:[#allocation2] sm:$0xff] (%p192_p6)  ;;  %v197_v31 = vld [vmem:[%s636_s0] sm:$0xff] (%p192_p6)  ;;  %v198_v32 = vld [vmem:[%s636_s0 + $0x8] sm:$0xff] (%p192_p6)  ;;  %s533_s23 = smov (%p192_p6), 1   ;;  %s534_s24 = smov (%p192_p6), 127   ;;  %vm270_vm2 = vcmask (%p192_p6), 23568  }
  0xb2   : > { %196 = sbr.rel (!%p192_p6) target bundleno = 574 (0x23e), region = 40  ;;  %v203_v18 = vld [vmem:[#allocation3] sm:$0xff] (%p192_p6)  ;;  %v201_v19 = vmul.f32 (%p192_p6), 0.125, %v199_v17  ;;  %s535_s25 = smov (%p192_p6), 2   ;;  %vm235_vm3 = vcmask (%p192_p6), 7168   ;;  %vm284_vm4 = vcmask (%p192_p6), 0  }
  0xb3   : > { %v205_v20 = vmul.f32 (%p192_p6), 0.125, %v203_v18  ;;  %s536_s26 = smov (%p192_p6), 126  }
  0xb4   : > { %v200_v21 = vld [vmem:[#allocation2 + $0x8] sm:$0xff] (%p192_p6)  ;;  %v207_v25 = vmul.f32 (%p192_p6), %v201_v19, %v201_v19 }
  0xb5   : > { %v202_v23 = vmul.f32 (%p192_p6), 0.125, %v200_v21 }
  0xb6   : > { %v204_v22 = vld [vmem:[#allocation3 + $0x8] sm:$0xff] (%p192_p6)  ;;  %v209_v27 = vsub.f32 (%p192_p6), %v205_v20, %v207_v25 }
  0xb7   : > { %v206_v24 = vmul.f32 (%p192_p6), 0.125, %v204_v22  ;;  %v208_v26 = vmul.f32 (%p192_p6), %v202_v23, %v202_v23 }
  0xb8   : > { %v211_v29 = vadd.f32 (%p192_p6), 1e-05, %v209_v27 }
  0xb9   : > { %v210_v28 = vsub.f32 %v206_v24, %v208_v26 }
  0xba   : > { %468 = vrsqrt.f32 %v211_v29 }
  0xbb   : > { %v212_v30 = vadd.f32 1e-05, %v210_v28 }
  0xbd   : > { %470 = vrsqrt.f32 %v212_v30 }
  0xc4   : > { %v469_v33 = vpop.eup %468 }
  0xc5   : > { %v215_v35 = vmul.f32 %v469_v33, %v197_v31 }
  0xc7   : > { %v471_v34 = vpop.eup %470  ;;  %v238_v37 = vmul.f32 %v215_v35, %v201_v19 }
  0xc8   : > { %v216_v36 = vmul.f32 %v471_v34, %v198_v32 }
  0xc9   : > { %242 = vrot.lane.b32.xlu0 %v238_v37, %s533_s23 }
  0xca   : > { %v239_v38 = vmul.f32 %v216_v36, %v202_v23 }
  0xcd   : > { %244 = vrot.lane.b32.xlu0 %v239_v38, %s533_s23 }
  0xd1   : > { %262 = vrot.lane.b32.xlu0 %v197_v31, %s534_s24 }
  0xd5   : > { %219 = vrot.lane.b32.xlu0 %v215_v35, %s535_s25 }
 0x13b   : > { %v243_v39 = vpop.permute.xlu0 %242 }
 0x13c   : > { %v248_v40 = vsub.f32 %v197_v31, %v243_v39 }
 0x13e   : > { %252 = vrot.lane.b32.xlu1 %v248_v40, %s533_s23 }
 0x13f   : > { %v245_v41 = vpop.permute.xlu0 %244 }
 0x140   : > { %v249_v42 = vsub.f32 %v198_v32, %v245_v41 }
 0x142   : > { %254 = vrot.lane.b32.xlu1 %v249_v42, %s533_s23 }
 0x143   : > { %v263_v43 = vpop.permute.xlu0 %262 }
 0x146   : > { %264 = vrot.lane.b32.xlu1 %v198_v32, %s534_s24 }
 0x147   : > { %v220_v44 = vpop.permute.xlu0 %219 }
 0x148   : > { %v225_v45 = vmul.f32 %v220_v44, %v197_v31 }
 0x14a   : > { %221 = vrot.lane.b32.xlu1 %v216_v36, %s535_s25  ;;  %229 = vrot.lane.b32.xlu0 %v225_v45, %s536_s26 }
 0x1b0   : > { %v253_v46 = vpop.permute.xlu1 %252 }
 0x1b1   : > { %v258_v47 = vmul.f32 %v253_v46, %v197_v31 }
 0x1b3   : > { %v268_v49 = vadd.f32 %v263_v43, %v258_v47 }
 0x1b4   : > { %v255_v48 = vpop.permute.xlu1 %254 }
 0x1b5   : > { %v259_v50 = vmul.f32 %v255_v48, %v198_v32  ;;  %v271_v53 = vsel %vm270_vm2, %v268_v49, 0.0 }
 0x1b8   : > { %v265_v51 = vpop.permute.xlu1 %264 }
 0x1b9   : > { %v269_v52 = vadd.f32 %v265_v51, %v259_v50 }
 0x1bb   : > { %v272_v54 = vsel %vm270_vm2, %v269_v52, 0.0 }
 0x1bc   : > { %v273_v55 = vadd.f32 %v272_v54, %v271_v53  ;;  %v222_v56 = vpop.permute.xlu1 %221  ;;  %v230_v57 = vpop.permute.xlu0 %229 }
 0x1bd   : > { %v226_v58 = vmul.f32 %v222_v56, %v198_v32  ;;  %236 = vst.msk [vmem:[#allocation4] sm:$0xff] %vm235_vm3, %v230_v57 }
 0x1be   : > { %v274_v59 = vrot.slane %v273_v55, 4 }
 0x1bf   : > { %231 = vrot.lane.b32.xlu1 %v226_v58, %s536_s26 }
 0x1c0   : > { %v275_v60 = vadd.f32 %v274_v59, %v273_v55 }
 0x1c2   : > { %v276_v61 = vrot.slane %v275_v60, 2 }
 0x1c4   : > { %v277_v62 = vadd.f32 %v276_v61, %v275_v60 }
 0x1c6   : > { %v278_v63 = vrot.slane %v277_v62, 1 }
 0x1c8   : > { %v279_v0 = vadd.f32 %v278_v63, %v277_v62 }
 0x1ca   : > { %281 = vrot.lane.b32.xlu0 %v279_v0, %s536_s26 }
 0x231   : > { %v232_v1 = vpop.permute.xlu1 %231 }
 0x232   : > { %237 = vst.msk [vmem:[#allocation4 + $0x8] sm:$0xff] %vm235_vm3, %v232_v1 }
 0x23c   : > { %v282_v2 = vpop.permute.xlu0 %281 }
 0x23d   : > { %285 = vst.msk [vmem:[#allocation5] sm:$0x1] %vm284_vm4, %v282_v2 }
 0x23e PF: > { %p418_p7 = scmp.ne.s32.totalorder %s522_s9, 1 }
 0x23f   : > { %v291_v3 = vld [vmem:[#allocation4] sm:$0xff] (!%p418_p7)  ;;  %v537_v5 = vmov (!%p418_p7), 0   ;;  %v292_v6 = vld [vmem:[#allocation4 + $0x8] sm:$0xff] (!%p418_p7)  ;;  %v289_v8 = vld [vmem:[%s637_s1] sm:$0xff] (!%p418_p7)  ;;  %v318_v13 = vlaneseq (!%p418_p7) }
 0x240   : > { %288 = sbr.rel (%p418_p7) target bundleno = 754 (0x2f2), region = 44  ;;  %472 = vset.pattern.permute.xlu0 (!%p418_p7), %v537_v5  ;;  %473 = vset.pattern.permute.xlu1 (!%p418_p7), %v537_v5  ;;  %v290_v9 = vld [vmem:[%s637_s1 + $0x8] sm:$0xff] (!%p418_p7) }
 0x241   : > { %295 = vperm.xlu0 (!%p418_p7), %472, %v291_v3   ;;  %v319_v16 = vshrl.u32 (!%p418_p7), %v318_v13, 7 }
 0x243   : > { %v320_v19 = vsub.s32 (!%p418_p7), 0, %v319_v16 }
 0x244   : > { %v312_v4 = vld [vmem:[#allocation5] sm:$0x1] (!%p418_p7) }
 0x245   : > { %315 = vperm.xlu1 (!%p418_p7), %473, %v312_v4   ;;  %300 = vperm.xlu0 (!%p418_p7), %472, %v292_v6  }
 0x2c0   : > { %v296_v7 = vpop.permute.xlu0 %295 }
 0x2c1   : > { %v303_v11 = vmul.f32 %v296_v7, %v289_v8 }
 0x2c4   : > { %v301_v10 = vpop.permute.xlu0 %300  ;;  %v316_v20 = vpop.permute.xlu1 %315 }
 0x2c5   : > { %v304_v12 = vmul.f32 %v301_v10, %v290_v9  ;;  %v321_v23 = vrot.slane %v316_v20, %v320_v19 }
 0x2c7   : > { %v305_v14 = vadd.f32 %v304_v12, %v303_v11 }
 0x2c9   : > { %v306_v15 = vrot.slane %v305_v14, 4 }
 0x2cb   : > { %v307_v17 = vadd.f32 %v306_v15, %v305_v14 }
 0x2cd   : > { %v308_v18 = vrot.slane %v307_v17, 2 }
 0x2cf   : > { %v309_v21 = vadd.f32 %v308_v18, %v307_v17 }
 0x2d1   : > { %v310_v22 = vrot.slane %v309_v21, 1 }
 0x2d3   : > { %v311_v24 = vadd.f32 %v310_v22, %v309_v21 }
 0x2d5   : > { %v322_v25 = vadd.f32 %v321_v23, %v311_v24 }
 0x2d7   : > { %v419_v26 = vmul.f32 -1.442695, %v322_v25 }
 0x2d9   : > { %474 = vpow2.f32 %v419_v26 }
 0x2e3   : > { %v475_v27 = vpop.eup %474 }
 0x2e4   : > { %v326_v28 = vadd.f32 1.0, %v475_v27 }
 0x2e6   : > { %476 = vrcp.f32 %v326_v28 }
 0x2f0   : > { %v477_v29 = vpop.eup %476 }
 0x2f1   : > { %329 = vst [vmem:[#allocation6] sm:$0x1] %v477_v29 }
 0x2f2 PF: > { %p602_p8 = scmp.eq.s32.totalorder %s410_s12, 1  ;;  %s538_s4 = smov [#allocation6]  }
 0x2f3   : > { %s344_s5 = sshll.u32 %s538_s4, 4  ;;  %s345_s5 = int_to_ptr.vmem [resolvable:$true] %s344_s5 }
 0x2f4   : > { %s478_s6 = scalar_lea.vmem %s345_s5, 16  ;;  %s484_s7 = scalar_lea.vmem %s345_s5, 32 }
 0x2f5   : > { %p479_p9 = scmp.ne.s32.totalorder %s345_s5, %s478_s6  ;;  %p485_p12 = scmp.lt.s32.totalorder %s345_s5, %s345_s5 }
 0x2f6   : > { %p486_p13 = scmp.lt.s32.totalorder %s484_s7, %s478_s6 }
 0x2f7   : > { %p480_p10 = pnand %p479_p9, %p602_p8 }
 0x2f8   : > { %p487_p0 = por %p486_p13, %p485_p12 }
 0x2f9   : > { %p481_p11 = pneg %p480_p10 }
 0x2fb   : > { %p488_p1 = pnand %p487_p0, %p481_p11 }
 0x2fd   : > { %491 = shalt.err (!%p488_p1)
}
 0x2fe   : > { %s492_s12 = scalar_lea.hbm %s638_s2, 16 }
 0x2ff   : > { %p493_p2 = scmp.ne.s32.totalorder %s638_s2, %s492_s12  ;;  %p498_p5 = scmp.lt.u32.totalorder %s492_s12, %s638_s2 }
 0x301   : > { %p494_p3 = pnand %p493_p2, %p602_p8 }
 0x303   : > { %p495_p4 = pneg %p494_p3 }
 0x305   : > { %p500_p6 = pnand %p498_p5, %p495_p4 }
 0x307   : > { %503 = shalt.err (!%p500_p6)
}
 0x308   : > { %427 = dma.vmem_to_hbm [thread:$0]  (%p602_p8), %s345_s5, 16, %s638_s2, [#allocation7]  }
 0x309 PF: > { %p435_p7 = scmp.ge.s32.totalorder %s530_s11, 2  ;;  %p436_p9 = scmp.eq.s32.totalorder %s411_s13, 1 }
 0x30b   : > { %p431_p10 = pnand %p436_p9, %p435_p7 }
 0x30d   : > { %517 = dma.done.wait (!%p431_p10), [#allocation7], 16  }
 0x30e   : > { %519 = vsyncadd (!%p431_p10), [#allocation7], 4294967280  ;;  %s15_s11 = sadd.s32 1, %s530_s11   ;;  %s640_s9 = smov %s526_s10 }
 0x30f   : > { %p12_p11 = scmp.ge.s32.totalorder %s15_s11, 4   ;;  %s641_s10 = smov %s643_s14 }
 0x311   :  { %14 = sbr.rel (!%p12_p11) target bundleno = 3 (0x3), region = 79 }
 0x318   :  { %361 = vsyncpa [#allocation7], 1 }
 0x319   :  { %363 = vsyncpa [#allocation7 + $0x1], 1 }

</bundles_post_ra>
